<compile_context>
chip_gen: v5e
topology: v5e:2x2
jax: 0.10.0
libtpu: 0.0.40
codegen_flags: <defaults>
</compile_context>

<pallas_src>
import functools
import math

import jax
import jax.numpy as jnp
import numpy as np
from jax.experimental import pallas as pl
from jax.experimental.pallas import tpu as pltpu


def make_positional_encoding_table(d_model, max_len=5000, dtype=jnp.float32):
    """Builds the same buffer as the torch __init__ (shape (max_len, 1, d_model)).

    Pass `dtype` equal to the activation dtype so the table is cast once at init
    (halves pe DMA traffic for bf16 activations) instead of per call.
    """
    position = jnp.arange(max_len, dtype=jnp.float32)[:, None]              # (max_len, 1)
    div_term = jnp.exp(
        jnp.arange(0, d_model, 2, dtype=jnp.float32) * (-math.log(10000.0) / d_model)
    )                                                                        # (d_model//2,)
    pe = jnp.zeros((max_len, d_model), dtype=jnp.float32)
    pe = pe.at[:, 0::2].set(jnp.sin(position * div_term))
    pe = pe.at[:, 1::2].set(jnp.cos(position * div_term))
    return pe[:, None, :].astype(dtype)                                      # (max_len, 1, d_model)


def _pos_enc_add_kernel(x_ref, pe_ref, o_ref, *, batch):
    # x_ref : (ts, B*D)  dense activation tile (lane axis = B*D)
    # pe_ref: (ts, D)    positional-encoding rows for this tile
    # o_ref : (ts, B*D)
    pe = pe_ref[...].astype(x_ref.dtype)
    if batch > 1:
        # Replicate the pe rows across the B lane-segments (D-aligned concat).
        pe = jnp.concatenate([pe] * batch, axis=-1)
    o_ref[...] = x_ref[...] + pe


def positional_encoding(x, pe, *, target_block_bytes=2 * 1024 * 1024):
    """Pallas equivalent of PositionalEncoding.forward.

    x : (S, B, d_model)        seq-first activations.
    pe: (max_len, 1, d_model)  table from make_positional_encoding_table.
    returns (S, B, d_model) = x + pe[:S]
    """
    S, B, D = x.shape
    max_len = pe.shape[0]
    assert max_len >= S and pe.shape[-1] == D, "pe table too small / wrong d_model"

    # Free (contiguous) reshapes to a lane/sublane-dense 2D layout.
    x2 = x.reshape(S, B * D)
    pe2 = pe.reshape(max_len, D)

    # Mem-bound kernel: largest seq tile such that one dense x tile is
    # ~target_block_bytes. True footprint (double-buffered x + out + pe) is then
    # ~5x that, comfortably under every chip's default scoped-VMEM limit.
    bytes_per_row = B * D * x.dtype.itemsize
    ts = int(max(1, min(target_block_bytes // bytes_per_row, S)))
    if ts != S:
        ts = max(8, (ts // 8) * 8)   # sublane-aligned block on the seq axis
        ts = min(ts, S)
    grid = pl.cdiv(S, ts)            # partial last block handled by Pallas masking

    kernel = functools.partial(_pos_enc_add_kernel, batch=B)

    out2 = pl.pallas_call(
        kernel,
        out_shape=jax.ShapeDtypeStruct((S, B * D), x.dtype),
        grid=(grid,),
        in_specs=[
            pl.BlockSpec((ts, B * D), lambda i: (i, 0)),   # dense activations
            pl.BlockSpec((ts, D), lambda i: (i, 0)),       # pe rows for this tile
        ],
        out_specs=pl.BlockSpec((ts, B * D), lambda i: (i, 0)),
        compiler_params=pltpu.CompilerParams(
            dimension_semantics=("parallel",),
        ),
    )(x2, pe2)

    return out2.reshape(S, B, D)


if __name__ == "__main__":
    key = jax.random.PRNGKey(0)
    d_model = 128
    max_len = 64
    pe = make_positional_encoding_table(d_model, max_len=max_len, dtype=jnp.float32)

    # Case 1: small shapes consistent with the module (seq=16, batch=2, d_model=128).
    S, B = 16, 2
    x = jax.random.normal(key, (S, B, d_model), dtype=jnp.float32)
    out = jax.block_until_ready(positional_encoding(x, pe))
    ref = x + pe[:S]
    np.testing.assert_allclose(np.asarray(out), np.asarray(ref), rtol=1e-6, atol=1e-6)

    # Case 2: multi-block grid with a partial last block (S=40, forced ts=16),
    # exercising the cdiv grid / masked-write path (no wrapper padding).
    S2 = 40
    x2 = jax.random.normal(jax.random.PRNGKey(1), (S2, B, d_model), dtype=jnp.float32)
    out2 = jax.block_until_ready(
        positional_encoding(x2, pe, target_block_bytes=16 * 1024)
    )
    ref2 = x2 + pe[:S2]
    np.testing.assert_allclose(np.asarray(out2), np.asarray(ref2), rtol=1e-6, atol=1e-6)

    print("KERNEL_OK")
</pallas_src>

<mosaic_0001>
module attributes {stable_mosaic.version = 11 : i64} {
  func.func @_pos_enc_add_kernel(%arg0: i32, %arg1: memref<16x256xf32, #tpu.memory_space<vmem>>, %arg2: memref<16x128xf32, #tpu.memory_space<vmem>>, %arg3: memref<16x256xf32, #tpu.memory_space<vmem>>) attributes {dimension_semantics = [#tpu.dimension_semantics<parallel>], iteration_bounds = array<i64: 1>, scalar_prefetch = 0 : i64, scratch_operands = 0 : i64, tpu.core_type = #tpu.core_type<tc>, window_params = [{transform_indices = @transform_0, window_bounds = array<i64: 16, 256>}, {transform_indices = @transform_1, window_bounds = array<i64: 16, 128>}, {transform_indices = @transform_2, window_bounds = array<i64: 16, 256>}]} {
    %c0 = arith.constant 0 : index
    %c0_0 = arith.constant 0 : index
    %0 = vector.load %arg2[%c0, %c0_0] : memref<16x128xf32, #tpu.memory_space<vmem>>, vector<16x128xf32>
    %1 = tpu.concatenate %0, %0 in 1 : vector<16x128xf32>, vector<16x128xf32> -> vector<16x256xf32>
    %c0_1 = arith.constant 0 : index
    %c0_2 = arith.constant 0 : index
    %2 = vector.load %arg1[%c0_1, %c0_2] : memref<16x256xf32, #tpu.memory_space<vmem>>, vector<16x256xf32>
    %3 = arith.addf %2, %1 : vector<16x256xf32>
    %c0_3 = arith.constant 0 : index
    %c0_4 = arith.constant 0 : index
    %4 = vector.load %arg3[%c0_3, %c0_4] : memref<16x256xf32, #tpu.memory_space<vmem>>, vector<16x256xf32>
    tpu.vector_store %arg3[%c0_3, %c0_4], %3 {strides = array<i32>} : memref<16x256xf32, #tpu.memory_space<vmem>>, vector<16x256xf32>,
    return
  }
  func.func @transform_0(%arg0: i32) -> (i32, i32) {
    %c0_i32 = arith.constant 0 : i32
    %c0_i32_0 = arith.constant 0 : i32
    return %arg0, %c0_i32 : i32, i32
  }
  func.func @transform_1(%arg0: i32) -> (i32, i32) {
    %c0_i32 = arith.constant 0 : i32
    %c0_i32_0 = arith.constant 0 : i32
    return %arg0, %c0_i32 : i32, i32
  }
  func.func @transform_2(%arg0: i32) -> (i32, i32) {
    %c0_i32 = arith.constant 0 : i32
    %c0_i32_0 = arith.constant 0 : i32
    return %arg0, %c0_i32 : i32, i32
  }
}

</mosaic_0001>

<bundles_post_ra>
// kernel: tpu_custom_call.1
= control target key start
LH: loop header
LB: loop body
LE: loop exit
PB: predicated region body
PF: predicated region fallthrough
CT: control target
= control target key end

     0   :  { %7 = vsyncpa [#allocation3], 0  ;;  %s200_s0 = inlined_call_operand.hbm [shape: f32[16,256], index: 0, kind: input, shape index: {}]   ;;  %s201_s1 = inlined_call_operand.hbm [shape: f32[64,128], index: 1, kind: input, shape index: {}]   ;;  %s202_s2 = inlined_call_operand.hbm [shape: f32[16,256], index: 2, kind: output, shape index: {}]  }
   0x1   :  { %8 = vsyncpa [#allocation6], 0 }
   0x2   :  { %9 = vsyncpa [#allocation4], 0  ;;  %s14_s11 = sshll.u32 %s200_s0, 4  ;;  %s163_s12 = smov [#allocation2]   ;;  %s15_s11 = int_to_ptr.hbm [resolvable:$true] %s14_s11 }
   0x3   :  { %s16_s13 = sshll.u32 %s163_s12, 4  ;;  %s27_s16 = sshll.u32 %s201_s1, 4  ;;  %s17_s13 = int_to_ptr.vmem [resolvable:$true] %s16_s13  ;;  %s28_s16 = int_to_ptr.hbm [resolvable:$true] %s27_s16 }
   0x4   :  { %s164_s17 = smov 256   ;;  %s165_s18 = smov 16  }
   0x5   :  { %22 = dma.hbm_to_vmem [thread:$0]  %s15_s11, 512, %s17_s13, [#allocation3], %s164_s17, %s164_s17, %s165_s18  }
   0x6   :  { %s166_s19 = smov [#allocation5]   ;;  %s167_s21 = smov 128  }
   0x7   :  { %s29_s20 = sshll.u32 %s166_s19, 4  ;;  %s168_s0 = smov 8   ;;  %s30_s20 = int_to_ptr.vmem [resolvable:$true] %s29_s20 }
   0x8   :  { %35 = dma.hbm_to_vmem [thread:$0]  %s28_s16, 256, %s30_s20, [#allocation6], %s167_s21, %s167_s21, %s168_s0  }
   0x9   :  { %157 = dma.done.wait [#allocation3], 512  }
   0xa   :  { %158 = vsyncadd [#allocation3], 4294966784 }
   0xb   :  { %159 = dma.done.wait [#allocation6], 256  }
   0xc   :  { %160 = vsyncadd [#allocation6], 4294967040  ;;  %v44_v0 = vld [vmem:[#allocation5] sm:$0xff]  ;;  %v47_v2 = vld [vmem:[#allocation2 + $0x8] sm:$0xff]  ;;  %s169_s1 = smov [#allocation7]   ;;  %s64_s25 = sshll.u32 %s202_s2, 4  ;;  %s65_s25 = int_to_ptr.hbm [resolvable:$true] %s64_s25 }
   0xd   :  { %v46_v1 = vld [vmem:[#allocation2] sm:$0xff]  ;;  %v51_v4 = vadd.f32 %v47_v2, %v44_v0  ;;  %v45_v5 = vld [vmem:[#allocation5 + $0x8] sm:$0xff]  ;;  %v48_v6 = vld [vmem:[#allocation2 + $0x10] sm:$0xff]  ;;  %s62_s22 = sshll.u32 %s169_s1, 4  ;;  %s63_s22 = int_to_ptr.vmem [resolvable:$true] %s62_s22 }
   0xe   :  { %v50_v3 = vadd.f32 %v46_v1, %v44_v0  ;;  %v49_v7 = vld [vmem:[#allocation2 + $0x18] sm:$0xff]  ;;  %v52_v8 = vadd.f32 %v48_v6, %v45_v5 }
   0xf   :  { %v53_v9 = vadd.f32 %v49_v7, %v45_v5  ;;  %55 = vst [vmem:[#allocation7 + $0x8] sm:$0xff] %v51_v4 }
  0x10   :  { %54 = vst [vmem:[#allocation7] sm:$0xff] %v50_v3 }
  0x11   :  { %56 = vst [vmem:[#allocation7 + $0x10] sm:$0xff] %v52_v8 }
  0x12   :  { %57 = vst [vmem:[#allocation7 + $0x18] sm:$0xff] %v53_v9 }
  0x13   :  { %70 = dma.vmem_to_hbm [thread:$0]  %s63_s22, 512, %s65_s25, [#allocation4], %s164_s17, %s164_s17, %s165_s18  }
  0x14   :  { %161 = dma.done.wait [#allocation4], 512  }
  0x15   :  { %162 = vsyncadd [#allocation4], 4294966784 }
  0x16   :  { %75 = vsyncpa [#allocation3], 1 }
  0x17   :  { %76 = vsyncpa [#allocation6], 1 }
  0x18   :  { %77 = vsyncpa [#allocation4], 1 }

</bundles_post_ra>
